<compile_context>
chip_gen: v7x
topology: tpu7x:2x2x1
jax: 0.10.0
libtpu: 0.0.40
codegen_flags: <defaults>
</compile_context>

<pallas_src>
import math

import jax
import jax.numpy as jnp
from jax import lax
from jax.experimental import pallas as pl
from jax.experimental.pallas import tpu as pltpu


# ----------------------------------------------------------------------------
# Kernels
# ----------------------------------------------------------------------------

def _lwc_kernel_single_k(x_ref, w_ref, b_ref, o_ref):
    # Single I-tile (K == 1): no scratch accumulator, one dense store.
    # x_ref: (Ct, Bt, It)  w_ref: (Ct, Ot, It)  b_ref: (Ct, 1, Ot)
    # o_ref: (Ct, Bt, Ot)
    acc = lax.dot_general(
        x_ref[...], w_ref[...],
        dimension_numbers=(((2,), (2,)), ((0,), (0,))),   # contract I, batch C
        preferred_element_type=jnp.float32,
    )
    o_ref[...] = (acc + b_ref[...].astype(jnp.float32)).astype(o_ref.dtype)


def _lwc_kernel_acc(x_ref, w_ref, b_ref, o_ref, acc_ref):
    # Multi I-tile (K > 1): f32 VMEM accumulator, k is the innermost grid axis.
    k = pl.program_id(3)

    partial = lax.dot_general(
        x_ref[...], w_ref[...],
        dimension_numbers=(((2,), (2,)), ((0,), (0,))),
        preferred_element_type=jnp.float32,
    )

    @pl.when(k == 0)
    def _first():
        acc_ref[...] = partial          # direct assign: no zero-init store

    @pl.when(k > 0)
    def _rest():
        acc_ref[...] += partial

    @pl.when(k == pl.num_programs(3) - 1)
    def _finalize():
        o_ref[...] = (acc_ref[...] + b_ref[...].astype(jnp.float32)
                      ).astype(o_ref.dtype)


# ----------------------------------------------------------------------------
# Host-side helpers
# ----------------------------------------------------------------------------

def _cdiv(a, b):
    return -(-a // b)


def _round_up(x, m):
    return _cdiv(x, m) * m


def _pad_to(arr, shape):
    pads = [(0, t - s) for s, t in zip(arr.shape, shape)]
    if any(hi for _, hi in pads):
        arr = jnp.pad(arr, pads)
    return arr


def _tpu_generation():
    try:
        kind = jax.devices()[0].device_kind.lower()
    except Exception:
        return "unknown"
    if "v7" in kind or "7x" in kind:
        return "v7x"
    if "v6" in kind:
        return "v6e"
    if "v5" in kind:
        return "v5e"
    return "unknown"


def _choose_tiles(C, B, O, I, itemsize, gen):
    """Pick (ct, bt, ot, it): lane-dense, balanced, per-generation budgets."""
    if gen in ("v5e", "v6e"):
        # 128 MiB physical VMEM: big tiles so K==1 is the common case.
        it_max, bt_max, ot_max = 2048, 512, 512
        budget = 48 * 1024 * 1024
    else:
        # v7x has 64 MiB VMEM per TensorCore (and 3.2 TB/s HBM); unknown
        # chips fall back to the same conservative budget.
        it_max, bt_max, ot_max = 1024, 256, 256
        budget = 20 * 1024 * 1024

    b_align = 16 if itemsize == 2 else 8

    # Balanced, alignment-rounded tiles. it/ot always multiples of 128
    # (lane-dense loads/stores, full MXU columns); bt multiple of 8/16.
    it = _round_up(_cdiv(I, _cdiv(I, it_max)), 128)
    ot = _round_up(_cdiv(O, _cdiv(O, ot_max)), 128)
    bt = _round_up(_cdiv(B, _cdiv(B, bt_max)), b_align)

    k_steps = _round_up(I, it) // it
    acc_bytes = 0 if k_steps == 1 else 4 * bt * ot
    per_channel = (2 * itemsize * (bt * it + ot * it + ot + bt * ot)  # dbl-buf
                   + acc_bytes)                                        # f32 acc
    ct = int(max(1, min(C, budget // max(per_channel, 1))))
    ct = _cdiv(C, _cdiv(C, ct))          # rebalance to avoid C-padding waste

    if gen == "v7x":
        # Megacore: make sure at least one "parallel" grid axis has extent >=2
        # so both TensorCores get work.
        if _cdiv(C, ct) == 1 and _cdiv(O, ot) == 1 and _cdiv(B, bt) == 1:
            if B > b_align:
                bt = _round_up(_cdiv(B, 2), b_align)
            elif C >= 2:
                ct = _cdiv(C, 2)

    return ct, bt, ot, it


# ----------------------------------------------------------------------------
# Entry points
# ----------------------------------------------------------------------------

def linear_with_channel_cm(x_cm, w, b, *, tiles=None, compute_dtype=None):
    """Channel-major per-channel linear (no layout transposes).

    x_cm: (C, B, I), w: (C, O, I), b: (C, O)  ->  (C, B, O)

    compute_dtype: optional cast for x/w (e.g. jnp.bfloat16, MXU-native);
    accumulation stays f32 and the output keeps the original x dtype.
    """
    C, B, I = x_cm.shape
    C_w, O, I_w = w.shape
    assert C == C_w and I == I_w and b.shape == (C, O)

    out_dtype = x_cm.dtype
    if compute_dtype is not None:
        x_cm = x_cm.astype(compute_dtype)
        w = w.astype(compute_dtype)
    itemsize = jnp.dtype(x_cm.dtype).itemsize

    gen = _tpu_generation()
    if tiles is None:
        ct, bt, ot, it = _choose_tiles(C, B, O, I, itemsize, gen)
    else:
        ct, bt, ot, it = tiles

    # Zero-pad to tile multiples (zeros are contraction-neutral; padded
    # B/O/C rows are sliced off at the end).
    Cp, Bp, Op, Ip = (_round_up(C, ct), _round_up(B, bt),
                      _round_up(O, ot), _round_up(I, it))
    x_p = _pad_to(x_cm, (Cp, Bp, Ip))
    w_p = _pad_to(w, (Cp, Op, Ip))
    b_p = _pad_to(b.reshape(C, 1, O), (Cp, 1, Op))

    K = Ip // it
    vmem_limit = (96 if gen in ("v5e", "v6e") else 48) * 1024 * 1024
    cost = pl.CostEstimate(
        flops=2 * Cp * Bp * Ip * Op,
        transcendentals=0,
        bytes_accessed=(itemsize * (Cp * Bp * Ip + Cp * Op * Ip)
                        + jnp.dtype(b.dtype).itemsize * Cp * Op
                        + jnp.dtype(out_dtype).itemsize * Cp * Bp * Op),
    )

    if K == 1:
        # Fast path: no accumulator scratch, weight tile reused across all
        # B tiles (its block index is independent of the innermost axis).
        out = pl.pallas_call(
            _lwc_kernel_single_k,
            out_shape=jax.ShapeDtypeStruct((Cp, Bp, Op), out_dtype),
            grid=(Cp // ct, Op // ot, Bp // bt),
            in_specs=[
                pl.BlockSpec((ct, bt, it), lambda c, o, bi: (c, bi, 0)),
                pl.BlockSpec((ct, ot, it), lambda c, o, bi: (c, o, 0)),
                pl.BlockSpec((ct, 1, ot), lambda c, o, bi: (c, 0, o)),
            ],
            out_specs=pl.BlockSpec((ct, bt, ot), lambda c, o, bi: (c, bi, o)),
            compiler_params=pltpu.CompilerParams(
                dimension_semantics=("parallel", "parallel", "parallel"),
                vmem_limit_bytes=vmem_limit,
            ),
            cost_estimate=cost,
        )(x_p, w_p, b_p)
    else:
        # Reduction path: k innermost ("arbitrary"), f32 VMEM accumulator.
        out = pl.pallas_call(
            _lwc_kernel_acc,
            out_shape=jax.ShapeDtypeStruct((Cp, Bp, Op), out_dtype),
            grid=(Cp // ct, Op // ot, Bp // bt, K),
            in_specs=[
                pl.BlockSpec((ct, bt, it), lambda c, o, bi, k: (c, bi, k)),
                pl.BlockSpec((ct, ot, it), lambda c, o, bi, k: (c, o, k)),
                pl.BlockSpec((ct, 1, ot), lambda c, o, bi, k: (c, 0, o)),
            ],
            out_specs=pl.BlockSpec((ct, bt, ot),
                                   lambda c, o, bi, k: (c, bi, o)),
            scratch_shapes=[pltpu.VMEM((ct, bt, ot), jnp.float32)],
            compiler_params=pltpu.CompilerParams(
                dimension_semantics=("parallel", "parallel", "parallel",
                                     "arbitrary"),
                vmem_limit_bytes=vmem_limit,
            ),
            cost_estimate=cost,
        )(x_p, w_p, b_p)

    if (Cp, Bp, Op) != (C, B, O):
        out = out[:C, :B, :O]
    return out


def linear_with_channel(x, w, b, *, tiles=None, compute_dtype=None):
    """PyTorch-layout wrapper: x (B, C, I), w (C, O, I), b (C, O) -> (B, C, O).

    The two transposes are layout glue for the torch calling convention only;
    channel-major callers should use linear_with_channel_cm and skip them.
    """
    out_cm = linear_with_channel_cm(jnp.transpose(x, (1, 0, 2)), w, b,
                                    tiles=tiles, compute_dtype=compute_dtype)
    return jnp.transpose(out_cm, (1, 0, 2))


def init_params(key, input_size, output_size, channel_size, dtype=jnp.float32):
    """Deterministic init mirroring the PyTorch module's reset_parameters.

    kaiming_uniform_(w, a=sqrt(3)) on a (C, O, I) tensor:
      fan_in = O * I; gain = sqrt(2 / (1 + a^2)) = sqrt(1/2)
      bound_w = sqrt(3) * gain / sqrt(fan_in)
    bias ~ U(-1/sqrt(fan_in), 1/sqrt(fan_in)).
    """
    kw, kb = jax.random.split(key)
    fan_in = output_size * input_size
    w_bound = math.sqrt(3.0) * math.sqrt(2.0 / (1.0 + 3.0)) / math.sqrt(fan_in)
    b_bound = 1.0 / math.sqrt(fan_in)
    w = jax.random.uniform(kw, (channel_size, output_size, input_size),
                           dtype=dtype, minval=-w_bound, maxval=w_bound)
    b = jax.random.uniform(kb, (channel_size, output_size),
                           dtype=dtype, minval=-b_bound, maxval=b_bound)
    return w, b


if __name__ == "__main__":
    key = jax.random.PRNGKey(0)
    k_x, k_p, k_rest = jax.random.split(key, 3)

    # --- Test 1: module-sized small shapes. Auto tiles -> K==1 fast path with
    #             lane-dense (128-padded) O/I tiles.
    B, C, I, O = 8, 4, 32, 16
    x = jax.random.normal(k_x, (B, C, I), dtype=jnp.float32)
    w, b = init_params(k_p, input_size=I, output_size=O, channel_size=C)

    out = jax.block_until_ready(linear_with_channel(x, w, b))
    ref = jnp.einsum("coi,bci->bco", w, x,
                     precision=lax.Precision.HIGHEST) + b[None, :, :]
    assert out.shape == (B, C, O)
    assert jnp.allclose(out, ref, atol=1e-5, rtol=1e-5)

    # --- Test 2: forced small tiles -> exercises the K>1 accumulator path,
    #             channel padding, B/O tiling and the first-k assign.
    B2, C2, I2, O2 = 16, 6, 256, 128
    k_x2, k_w2, k_b2 = jax.random.split(k_rest, 3)
    x2 = jax.random.normal(k_x2, (B2, C2, I2), dtype=jnp.float32)
    w2 = jax.random.normal(k_w2, (C2, O2, I2), dtype=jnp.float32) * 0.05
    b2 = jax.random.normal(k_b2, (C2, O2), dtype=jnp.float32)

    out2 = jax.block_until_ready(
        linear_with_channel(x2, w2, b2, tiles=(4, 8, 128, 128)))  # ct,bt,ot,it
    ref2 = jnp.einsum("coi,bci->bco", w2, x2,
                      precision=lax.Precision.HIGHEST) + b2[None, :, :]
    assert out2.shape == (B2, C2, O2)
    assert jnp.allclose(out2, ref2, atol=2e-3, rtol=2e-3)

    # --- Test 3: auto tiles + optional bf16 compute path (MXU-native dtype,
    #             f32 accumulation, f32 output).
    out3 = jax.block_until_ready(
        linear_with_channel(x2, w2, b2, compute_dtype=jnp.bfloat16))
    assert out3.dtype == jnp.float32
    assert jnp.allclose(out3, ref2, atol=7e-2, rtol=7e-2)

    print("KERNEL_OK")
</pallas_src>

<mosaic_0001>
module attributes {stable_mosaic.version = 11 : i64} {
  func.func @_lwc_kernel_single_k(%arg0: i32, %arg1: i32, %arg2: i32, %arg3: memref<4x8x128xf32, #tpu.memory_space<vmem>>, %arg4: memref<4x128x128xf32, #tpu.memory_space<vmem>>, %arg5: memref<4x1x128xf32, #tpu.memory_space<vmem>>, %arg6: memref<4x8x128xf32, #tpu.memory_space<vmem>>) attributes {dimension_semantics = [#tpu.dimension_semantics<parallel>, #tpu.dimension_semantics<parallel>, #tpu.dimension_semantics<parallel>], iteration_bounds = array<i64: 1, 1, 1>, scalar_prefetch = 0 : i64, scratch_operands = 0 : i64, tpu.core_type = #tpu.core_type<tc>, window_params = [{transform_indices = @transform_0, window_bounds = array<i64: 4, 8, 128>}, {transform_indices = @transform_1, window_bounds = array<i64: 4, 128, 128>}, {transform_indices = @transform_2, window_bounds = array<i64: 4, 1, 128>}, {transform_indices = @transform_3, window_bounds = array<i64: 4, 8, 128>}]} {
    %c0 = arith.constant 0 : index
    %c0_0 = arith.constant 0 : index
    %c0_1 = arith.constant 0 : index
    %0 = vector.load %arg3[%c0, %c0_0, %c0_1] : memref<4x8x128xf32, #tpu.memory_space<vmem>>, vector<4x8x128xf32>
    %c0_2 = arith.constant 0 : index
    %c0_3 = arith.constant 0 : index
    %c0_4 = arith.constant 0 : index
    %1 = vector.load %arg4[%c0_2, %c0_3, %c0_4] : memref<4x128x128xf32, #tpu.memory_space<vmem>>, vector<4x128x128xf32>
    %cst = arith.constant dense<0.000000e+00> : vector<4x8x128xf32>
    %2 = tpu.matmul %0, %1, %cst {dimension_numbers = #tpu.dot_dimension_numbers<[2], [2], [1], [1], [0, 0, 0, 1, 1, 1], [0], [0]>} : vector<4x8x128xf32>, vector<4x128x128xf32>, vector<4x8x128xf32> -> vector<4x8x128xf32>
    %c0_5 = arith.constant 0 : index
    %c0_6 = arith.constant 0 : index
    %c0_7 = arith.constant 0 : index
    %3 = vector.load %arg5[%c0_5, %c0_6, %c0_7] : memref<4x1x128xf32, #tpu.memory_space<vmem>>, vector<4x1x128xf32>
    %4 = vector.broadcast %3 : vector<4x1x128xf32> to vector<4x8x128xf32>
    %5 = arith.addf %2, %4 : vector<4x8x128xf32>
    %c0_8 = arith.constant 0 : index
    %c0_9 = arith.constant 0 : index
    %c0_10 = arith.constant 0 : index
    %6 = vector.load %arg6[%c0_8, %c0_9, %c0_10] : memref<4x8x128xf32, #tpu.memory_space<vmem>>, vector<4x8x128xf32>
    tpu.vector_store %arg6[%c0_8, %c0_9, %c0_10], %5 {strides = array<i32>} : memref<4x8x128xf32, #tpu.memory_space<vmem>>, vector<4x8x128xf32>,
    return
  }
  func.func @transform_0(%arg0: i32, %arg1: i32, %arg2: i32) -> (i32, i32, i32) {
    %c0_i32 = arith.constant 0 : i32
    %c0_i32_0 = arith.constant 0 : i32
    return %arg0, %arg2, %c0_i32 : i32, i32, i32
  }
  func.func @transform_1(%arg0: i32, %arg1: i32, %arg2: i32) -> (i32, i32, i32) {
    %c0_i32 = arith.constant 0 : i32
    %c0_i32_0 = arith.constant 0 : i32
    return %arg0, %arg1, %c0_i32 : i32, i32, i32
  }
  func.func @transform_2(%arg0: i32, %arg1: i32, %arg2: i32) -> (i32, i32, i32) {
    %c0_i32 = arith.constant 0 : i32
    %c0_i32_0 = arith.constant 0 : i32
    return %arg0, %c0_i32, %arg1 : i32, i32, i32
  }
  func.func @transform_3(%arg0: i32, %arg1: i32, %arg2: i32) -> (i32, i32, i32) {
    %c0_i32 = arith.constant 0 : i32
    return %arg0, %arg2, %arg1 : i32, i32, i32
  }
}

</mosaic_0001>

<bundles_post_ra>
// kernel: tpu_custom_call.1
= control target key start
LH: loop header
LB: loop body
LE: loop exit
PB: predicated region body
PF: predicated region fallthrough
CT: control target
= control target key end

     0   :  { %8 = vsyncpa [#allocation3], 0  ;;  %s954_s0 = inlined_call_operand.hbm [shape: f32[4,8,128], index: 0, kind: input, shape index: {}]   ;;  %s955_s1 = inlined_call_operand.hbm [shape: f32[4,128,128], index: 1, kind: input, shape index: {}]   ;;  %s956_s2 = inlined_call_operand.vmem [shape: f32[4,1,128], index: 2, kind: input, shape index: {}]   ;;  %s957_s3 = inlined_call_operand.hbm [shape: f32[4,8,128], index: 3, kind: output, shape index: {}]  }
   0x1   :  { %9 = vsyncpa [#allocation6], 0 }
   0x2   :  { %10 = vsyncpa [#allocation4], 0  ;;  %s829_s12 = smov [#allocation2]   ;;  %s757_s16 = scalar_lea.hbm %s954_s0, 512 }
   0x3   :  { %s16_s13 = sshll.u32 %s829_s12, 4  ;;  %p758_p0 = scmp.ne.s32.totalorder %s954_s0, %s757_s16  ;;  %s17_s13 = int_to_ptr.vmem [resolvable:$true] %s16_s13 }
   0x4   :  { %p761_p1 = scmp.lt.u32.totalorder %s757_s16, %s954_s0 }
   0x6   :  { %p763_p2 = pnand %p761_p1, %p758_p0 }
   0x8   :  { %766 = shalt.err (!%p763_p2)
}
   0x9   :  { %s767_s21 = scalar_lea.vmem %s17_s13, 512  ;;  %p772_p4 = scmp.lt.s32.totalorder %s17_s13, %s17_s13 }
   0xa   :  { %p768_p3 = scmp.ne.s32.totalorder %s17_s13, %s767_s21  ;;  %p773_p5 = scmp.lt.s32.totalorder %s767_s21, %s767_s21 }
   0xc   :  { %p774_p6 = por %p773_p5, %p772_p4 }
   0xe   :  { %p775_p7 = pnand %p774_p6, %p768_p3 }
  0x10   :  { %778 = shalt.err (!%p775_p7)
}
  0x11   :  { %s830_s22 = smov 128   ;;  %s831_s23 = smov 8  }
  0x12   :  { %22 = dma.hbm_to_vmem [thread:$0]  %s954_s0, 512, %s17_s13, [#allocation3], %s830_s22, %s830_s22, %s831_s23  }
  0x13   :  { %s832_s26 = smov [#allocation5]   ;;  %s779_s30 = scalar_lea.hbm %s955_s1, 8192 }
  0x14   :  { %s28_s27 = sshll.u32 %s832_s26, 4  ;;  %p780_p8 = scmp.ne.s32.totalorder %s955_s1, %s779_s30  ;;  %s29_s27 = int_to_ptr.vmem [resolvable:$true] %s28_s27 }
  0x15   :  { %p783_p9 = scmp.lt.u32.totalorder %s779_s30, %s955_s1 }
  0x17   :  { %p785_p10 = pnand %p783_p9, %p780_p8 }
  0x19   :  { %788 = shalt.err (!%p785_p10)
}
  0x1a   :  { %s789_s8 = scalar_lea.vmem %s29_s27, 8192  ;;  %p794_p12 = scmp.lt.s32.totalorder %s29_s27, %s29_s27 }
  0x1b   :  { %p790_p11 = scmp.ne.s32.totalorder %s29_s27, %s789_s8  ;;  %p795_p13 = scmp.lt.s32.totalorder %s789_s8, %s789_s8 }
  0x1d   :  { %p796_p0 = por %p795_p13, %p794_p12 }
  0x1f   :  { %p797_p1 = pnand %p796_p0, %p790_p11 }
  0x21   :  { %800 = shalt.err (!%p797_p1)
}
  0x22   :  { %34 = dma.hbm_to_vmem [thread:$0]  %s955_s1, 8192, %s29_s27, [#allocation6], %s830_s22, %s830_s22, %s831_s23  }
  0x23   :  { %823 = dma.done.wait [#allocation3], 512  }
  0x24   :  { %824 = vsyncadd [#allocation3], 4294966784 }
  0x25   :  { %825 = dma.done.wait [#allocation6], 8192  }
  0x26   :  { %826 = vsyncadd [#allocation6], 4294959104  ;;  %v833_v0 = vmov 0.0|0.0   ;;  %vm834_vm0 = vmmov 0   ;;  %v835_v1 = vmov 0.0   ;;  %v47_v2 = vld [vmem:[#allocation5] sm:$0xff] }
  0x27   :  { %653 = vmatprep.subr.bf16.mxu0 %v833_v0  ;;  %677 = vmatprep.subr.bf16.mxu1 %v833_v0  ;;  %v48_v3 = vld [vmem:[#allocation5 + $0x8] sm:$0xff]  ;;  %v63_v4 = vld [vmem:[#allocation5 + $0x80] sm:$0xff]  ;;  %v49_v8 = vld [vmem:[#allocation5 + $0x10] sm:$0xff]  ;;  %s836_s17 = smov [#allocation7]  }
  0x28   :  { %545 = vmatprep.mubr.msk.f32.mxu0 %vm834_vm0, %v835_v1  ;;  %580 = vmatprep.mubr.msk.f32.mxu1 %vm834_vm0, %v835_v1  ;;  %v654_v5 = vpack.c.bf16 %v48_v3, %v47_v2  ;;  %v64_v6 = vld [vmem:[#allocation5 + $0x88] sm:$0xff]  ;;  %v50_v9 = vld [vmem:[#allocation5 + $0x18] sm:$0xff]  ;;  %v65_v10 = vld [vmem:[#allocation5 + $0x90] sm:$0xff]  ;;  %s428_s18 = sshll.u32 %s836_s17, 4  ;;  %s429_s18 = int_to_ptr.vmem [resolvable:$true] %s428_s18 }
  0x29   :  { %v678_v7 = vpack.c.bf16 %v64_v6, %v63_v4  ;;  %v66_v11 = vld [vmem:[#allocation5 + $0x98] sm:$0xff]  ;;  %v657_v12 = vpack.c.bf16 %v50_v9, %v49_v8  ;;  %v51_v14 = vld [vmem:[#allocation5 + $0x20] sm:$0xff]  ;;  %v52_v15 = vld [vmem:[#allocation5 + $0x28] sm:$0xff]  ;;  %s801_s19 = scalar_lea.vmem %s429_s18, 512  ;;  %p806_p3 = scmp.lt.s32.totalorder %s429_s18, %s429_s18 }
  0x2a   :  { %655 = vmatpush3.bf16.xpose.msra.mxu0 %v654_v5  ;;  %v681_v13 = vpack.c.bf16 %v66_v11, %v65_v10  ;;  %v67_v16 = vld [vmem:[#allocation5 + $0xa0] sm:$0xff]  ;;  %v68_v17 = vld [vmem:[#allocation5 + $0xa8] sm:$0xff]  ;;  %v660_v18 = vpack.c.bf16 %v52_v15, %v51_v14  ;;  %v53_v20 = vld [vmem:[#allocation5 + $0x30] sm:$0xff]  ;;  %p802_p2 = scmp.ne.s32.totalorder %s429_s18, %s801_s19  ;;  %p807_p4 = scmp.lt.s32.totalorder %s801_s19, %s801_s19 }
  0x2b   :  { %679 = vmatpush3.bf16.xpose.msra.mxu1 %v678_v7  ;;  %656 = vmatprep.subr.bf16.mxu0 %v833_v0  ;;  %v684_v19 = vpack.c.bf16 %v68_v17, %v67_v16  ;;  %v54_v21 = vld [vmem:[#allocation5 + $0x38] sm:$0xff]  ;;  %v69_v22 = vld [vmem:[#allocation5 + $0xb0] sm:$0xff]  ;;  %v55_v26 = vld [vmem:[#allocation5 + $0x40] sm:$0xff] }
  0x2c   :  { %680 = vmatprep.subr.bf16.mxu1 %v833_v0  ;;  %v70_v23 = vld [vmem:[#allocation5 + $0xb8] sm:$0xff]  ;;  %v663_v24 = vpack.c.bf16 %v54_v21, %v53_v20  ;;  %v56_v27 = vld [vmem:[#allocation5 + $0x48] sm:$0xff]  ;;  %v71_v28 = vld [vmem:[#allocation5 + $0xc0] sm:$0xff]  ;;  %p808_p5 = por %p807_p4, %p806_p3 }
  0x2d   :  { %v687_v25 = vpack.c.bf16 %v70_v23, %v69_v22  ;;  %v72_v29 = vld [vmem:[#allocation5 + $0xc8] sm:$0xff]  ;;  %v666_v30 = vpack.c.bf16 %v56_v27, %v55_v26  ;;  %v57_v32 = vld [vmem:[#allocation5 + $0x50] sm:$0xff]  ;;  %v58_v33 = vld [vmem:[#allocation5 + $0x58] sm:$0xff] }
  0x2e   :  { %v690_v31 = vpack.c.bf16 %v72_v29, %v71_v28  ;;  %v73_v34 = vld [vmem:[#allocation5 + $0xd0] sm:$0xff]  ;;  %v74_v35 = vld [vmem:[#allocation5 + $0xd8] sm:$0xff]  ;;  %v669_v36 = vpack.c.bf16 %v58_v33, %v57_v32  ;;  %v59_v38 = vld [vmem:[#allocation5 + $0x60] sm:$0xff]  ;;  %p809_p6 = pnand %p808_p5, %p802_p2 }
  0x2f   :  { %v693_v37 = vpack.c.bf16 %v74_v35, %v73_v34  ;;  %v60_v39 = vld [vmem:[#allocation5 + $0x68] sm:$0xff]  ;;  %v75_v40 = vld [vmem:[#allocation5 + $0xe0] sm:$0xff]  ;;  %v61_v44 = vld [vmem:[#allocation5 + $0x70] sm:$0xff] }
  0x30   :  { %v76_v41 = vld [vmem:[#allocation5 + $0xe8] sm:$0xff]  ;;  %v672_v42 = vpack.c.bf16 %v60_v39, %v59_v38  ;;  %v62_v45 = vld [vmem:[#allocation5 + $0x78] sm:$0xff]  ;;  %v77_v46 = vld [vmem:[#allocation5 + $0xf0] sm:$0xff] }
  0x31   :  { %v696_v43 = vpack.c.bf16 %v76_v41, %v75_v40  ;;  %v78_v47 = vld [vmem:[#allocation5 + $0xf8] sm:$0xff]  ;;  %v675_v48 = vpack.c.bf16 %v62_v45, %v61_v44  ;;  %v79_v50 = vld [vmem:[#allocation5 + $0x100] sm:$0xff]  ;;  %v80_v51 = vld [vmem:[#allocation5 + $0x108] sm:$0xff] }
  0x32   :  { %658 = vmatpush3.bf16.xpose.msra.mxu0 %v657_v12  ;;  %v699_v49 = vpack.c.bf16 %v78_v47, %v77_v46  ;;  %v95_v52 = vld [vmem:[#allocation5 + $0x180] sm:$0xff]  ;;  %v96_v53 = vld [vmem:[#allocation5 + $0x188] sm:$0xff]  ;;  %v702_v55 = vpack.c.bf16 %v80_v51, %v79_v50  ;;  %v81_v58 = vld [vmem:[#allocation5 + $0x110] sm:$0xff] }
  0x33   :  { %682 = vmatpush3.bf16.xpose.msra.mxu1 %v681_v13  ;;  %659 = vmatprep.subr.bf16.mxu0 %v833_v0  ;;  %v43_v54 = vld [vmem:[#allocation2] sm:$0xff]  ;;  %v44_v56 = vld [vmem:[#allocation2 + $0x8] sm:$0xff]  ;;  %v726_v57 = vpack.c.bf16 %v96_v53, %v95_v52  ;;  %v82_v59 = vld [vmem:[#allocation5 + $0x118] sm:$0xff] }
  0x34   :  { %683 = vmatprep.subr.bf16.mxu1 %v833_v0  ;;  %v97_v60 = vld [vmem:[#allocation5 + $0x190] sm:$0xff]  ;;  %v98_v61 = vld [vmem:[#allocation5 + $0x198] sm:$0xff]  ;;  %v705_v62 = vpack.c.bf16 %v82_v59, %v81_v58  ;;  %v83_v2 = vld [vmem:[#allocation5 + $0x120] sm:$0xff] }
  0x35   :  { %v729_v63 = vpack.c.bf16 %v98_v61, %v97_v60  ;;  %v84_v3 = vld [vmem:[#allocation5 + $0x128] sm:$0xff]  ;;  %v99_v4 = vld [vmem:[#allocation5 + $0x1a0] sm:$0xff]  ;;  %v85_v8 = vld [vmem:[#allocation5 + $0x130] sm:$0xff] }
  0x36   :  { %v100_v5 = vld [vmem:[#allocation5 + $0x1a8] sm:$0xff]  ;;  %v708_v6 = vpack.c.bf16 %v84_v3, %v83_v2  ;;  %v101_v9 = vld [vmem:[#allocation5 + $0x1b0] sm:$0xff]  ;;  %v102_v10 = vld [vmem:[#allocation5 + $0x1b8] sm:$0xff] }
  0x37   :  { %v732_v7 = vpack.c.bf16 %v100_v5, %v99_v4  ;;  %v735_v12 = vpack.c.bf16 %v102_v10, %v101_v9  ;;  %v87_v13 = vld [vmem:[#allocation5 + $0x140] sm:$0xff]  ;;  %v88_v14 = vld [vmem:[#allocation5 + $0x148] sm:$0xff]  ;;  %v90_v20 = vld [vmem:[#allocation5 + $0x158] sm:$0xff] }
  0x38   :  { %v103_v15 = vld [vmem:[#allocation5 + $0x1c0] sm:$0xff]  ;;  %v104_v16 = vld [vmem:[#allocation5 + $0x1c8] sm:$0xff]  ;;  %v714_v17 = vpack.c.bf16 %v88_v14, %v87_v13  ;;  %v105_v21 = vld [vmem:[#allocation5 + $0x1d0] sm:$0xff] }
  0x39   :  { %v106_v22 = vld [vmem:[#allocation5 + $0x1d8] sm:$0xff]  ;;  %v92_v26 = vld [vmem:[#allocation5 + $0x168] sm:$0xff]  ;;  %v107_v27 = vld [vmem:[#allocation5 + $0x1e0] sm:$0xff] }
  0x3a   :  { %661 = vmatpush3.bf16.xpose.msra.mxu0 %v660_v18  ;;  %v738_v18 = vpack.c.bf16 %v104_v16, %v103_v15  ;;  %v108_v28 = vld [vmem:[#allocation5 + $0x1e8] sm:$0xff]  ;;  %v94_v32 = vld [vmem:[#allocation5 + $0x178] sm:$0xff]  ;;  %v109_v33 = vld [vmem:[#allocation5 + $0x1f0] sm:$0xff] }
  0x3b   :  { %685 = vmatpush3.bf16.xpose.msra.mxu1 %v684_v19  ;;  %662 = vmatprep.subr.bf16.mxu0 %v833_v0  ;;  %v89_v19 = vld [vmem:[#allocation5 + $0x150] sm:$0xff]  ;;  %v110_v34 = vld [vmem:[#allocation5 + $0x1f8] sm:$0xff]  ;;  %v441_v39 = vld [vmem:[%s956_s2] ss:$0 sm:$0xff] }
  0x3c   :  { %686 = vmatprep.subr.bf16.mxu1 %v833_v0  ;;  %v717_v23 = vpack.c.bf16 %v90_v20, %v89_v19  ;;  %v46_v38 = vld [vmem:[#allocation2 + $0x18] sm:$0xff]  ;;  %v442_v40 = vld [vmem:[%s956_s2 + $0x1] ss:$0 sm:$0xff]  ;;  %v443_v46 = vld [vmem:[%s956_s2 + $0x2] ss:$0 sm:$0xff] }
  0x3d   :  { %v444_v47 = vld [vmem:[%s956_s2 + $0x3] ss:$0 sm:$0xff] }
  0x42   :  { %664 = vmatpush3.bf16.xpose.msra.mxu0 %v663_v24  ;;  %v741_v24 = vpack.c.bf16 %v106_v22, %v105_v21 }
  0x43   :  { %688 = vmatpush3.bf16.xpose.msra.mxu1 %v687_v25  ;;  %665 = vmatprep.subr.bf16.mxu0 %v833_v0  ;;  %v91_v25 = vld [vmem:[#allocation5 + $0x160] sm:$0xff] }
  0x44   :  { %689 = vmatprep.subr.bf16.mxu1 %v833_v0  ;;  %v720_v29 = vpack.c.bf16 %v92_v26, %v91_v25 }
  0x4a   :  { %667 = vmatpush3.bf16.xpose.msra.mxu0 %v666_v30  ;;  %v744_v30 = vpack.c.bf16 %v108_v28, %v107_v27 }
  0x4b   :  { %691 = vmatpush3.bf16.xpose.msra.mxu1 %v690_v31  ;;  %668 = vmatprep.subr.bf16.mxu0 %v833_v0  ;;  %v93_v31 = vld [vmem:[#allocation5 + $0x170] sm:$0xff] }
  0x4c   :  { %692 = vmatprep.subr.bf16.mxu1 %v833_v0  ;;  %v723_v35 = vpack.c.bf16 %v94_v32, %v93_v31 }
  0x52   :  { %670 = vmatpush3.bf16.xpose.msra.mxu0 %v669_v36  ;;  %v747_v36 = vpack.c.bf16 %v110_v34, %v109_v33 }
  0x53   :  { %694 = vmatpush3.bf16.xpose.msra.mxu1 %v693_v37  ;;  %671 = vmatprep.subr.bf16.mxu0 %v833_v0  ;;  %v45_v37 = vld [vmem:[#allocation2 + $0x10] sm:$0xff] }
  0x54   :  { %695 = vmatprep.subr.bf16.mxu1 %v833_v0 }
  0x5a   :  { %673 = vmatpush3.bf16.xpose.msra.mxu0 %v672_v42 }
  0x5b   :  { %697 = vmatpush3.bf16.xpose.msra.mxu1 %v696_v43  ;;  %674 = vmatprep.subr.bf16.mxu0 %v833_v0 }
  0x5c   :  { %698 = vmatprep.subr.bf16.mxu1 %v833_v0 }
  0x62   :  { %676 = vmatpush3.bf16.xpose.msra.mxu0 %v675_v48 }
  0x63   :  { %700 = vmatpush3.bf16.xpose.msra.mxu1 %v699_v49  ;;  %701 = vmatprep.subr.bf16.mxu0 %v833_v0 }
  0x64   :  { %725 = vmatprep.subr.bf16.mxu1 %v833_v0 }
  0x69   :  { %546 = vmatmul.mubr.f32.vlgmr.msra.gmra.mrb[0].mxu0 %v43_v54 }
  0x6a   :  { %581 = vmatmul.mubr.f32.vlgmr.msra.gmra.mrb[0].mxu1 %v44_v56  ;;  %703 = vmatpush3.bf16.xpose.msra.mxu0 %v702_v55 }
  0x6b   :  { %727 = vmatpush3.bf16.xpose.msra.mxu1 %v726_v57  ;;  %704 = vmatprep.subr.bf16.mxu0 %v833_v0 }
  0x6c   :  { %728 = vmatprep.subr.bf16.mxu1 %v833_v0  ;;  %615 = vmatprep.mubr.msk.f32.mxu0 %vm834_vm0, %v835_v1 }
  0x6d   :  { %650 = vmatprep.mubr.msk.f32.mxu1 %vm834_vm0, %v835_v1  ;;  %v86_v1 = vld [vmem:[#allocation5 + $0x138] sm:$0xff] }
  0x6e   :  { %v711_v11 = vpack.c.bf16 %v86_v1, %v85_v8 }
  0x72   :  { %706 = vmatpush3.bf16.xpose.msra.mxu0 %v705_v62 }
  0x73   :  { %730 = vmatpush3.bf16.xpose.msra.mxu1 %v729_v63  ;;  %707 = vmatprep.subr.bf16.mxu0 %v833_v0 }
  0x74   :  { %731 = vmatprep.subr.bf16.mxu1 %v833_v0 }
  0x7a   :  { %709 = vmatpush3.bf16.xpose.msra.mxu0 %v708_v6 }
  0x7b   :  { %733 = vmatpush3.bf16.xpose.msra.mxu1 %v732_v7  ;;  %710 = vmatprep.subr.bf16.mxu0 %v833_v0 }
  0x7c   :  { %734 = vmatprep.subr.bf16.mxu1 %v833_v0 }
  0x82   :  { %712 = vmatpush3.bf16.xpose.msra.mxu0 %v711_v11 }
  0x83   :  { %736 = vmatpush3.bf16.xpose.msra.mxu1 %v735_v12  ;;  %713 = vmatprep.subr.bf16.mxu0 %v833_v0 }
  0x84   :  { %737 = vmatprep.subr.bf16.mxu1 %v833_v0 }
  0x8a   :  { %715 = vmatpush3.bf16.xpose.msra.mxu0 %v714_v17 }
  0x8b   :  { %739 = vmatpush3.bf16.xpose.msra.mxu1 %v738_v18  ;;  %716 = vmatprep.subr.bf16.mxu0 %v833_v0 }
  0x8c   :  { %740 = vmatprep.subr.bf16.mxu1 %v833_v0 }
  0x92   :  { %718 = vmatpush3.bf16.xpose.msra.mxu0 %v717_v23 }
  0x93   :  { %742 = vmatpush3.bf16.xpose.msra.mxu1 %v741_v24  ;;  %719 = vmatprep.subr.bf16.mxu0 %v833_v0 }
  0x94   :  { %743 = vmatprep.subr.bf16.mxu1 %v833_v0 }
  0x9a   :  { %721 = vmatpush3.bf16.xpose.msra.mxu0 %v720_v29 }
  0x9b   :  { %745 = vmatpush3.bf16.xpose.msra.mxu1 %v744_v30  ;;  %722 = vmatprep.subr.bf16.mxu0 %v833_v0 }
  0x9c   :  { %746 = vmatprep.subr.bf16.mxu1 %v833_v0 }
  0xa2   :  { %724 = vmatpush3.bf16.xpose.msra.mxu0 %v723_v35 }
  0xa3   :  { %748 = vmatpush3.bf16.xpose.msra.mxu1 %v747_v36 }
  0xa9   :  { %616 = vmatmul.mubr.f32.vlgmr.msra.gmra.mrb[2].mxu0 %v45_v37 }
  0xaa   :  { %651 = vmatmul.mubr.f32.vlgmr.msra.gmra.mrb[2].mxu1 %v46_v38 }
 0x13c   :  { %v205_v41 = vpop.f32.mrb[0].mxu0 }
 0x13d   :  { %v206_v0 = vadd.f32 %v441_v39, %v205_v41  ;;  %v275_v42 = vpop.f32.mrb[0].mxu1  ;;  %v547_v43 = vpop.f32.mrb[1].mxu0 }
 0x13e   :  { %v276_v44 = vadd.f32 %v442_v40, %v275_v42  ;;  %v582_v45 = vpop.f32.mrb[1].mxu1 }
 0x13f   :  { %419 = vst [vmem:[#allocation7] sm:$0xff] %v206_v0 }
 0x140   :  { %420 = vst [vmem:[#allocation7 + $0x8] sm:$0xff] %v276_v44 }
 0x17c   :  { %v345_v48 = vpop.f32.mrb[2].mxu0 }
 0x17d   :  { %v346_v49 = vadd.f32 %v443_v46, %v345_v48  ;;  %v415_v50 = vpop.f32.mrb[2].mxu1  ;;  %v617_v51 = vpop.f32.mrb[3].mxu0 }
 0x17e   :  { %v416_v52 = vadd.f32 %v444_v47, %v415_v50  ;;  %v652_v53 = vpop.f32.mrb[3].mxu1 }
 0x17f   :  { %421 = vst [vmem:[#allocation7 + $0x10] sm:$0xff] %v346_v49 }
 0x180   :  { %422 = vst [vmem:[#allocation7 + $0x18] sm:$0xff] %v416_v52 }
 0x181   :  { %812 = shalt.err (!%p809_p6)
}
 0x182   :  { %s813_s21 = scalar_lea.hbm %s957_s3, 512 }
 0x183   :  { %p814_p7 = scmp.ne.s32.totalorder %s957_s3, %s813_s21  ;;  %p817_p8 = scmp.lt.u32.totalorder %s813_s21, %s957_s3 }
 0x185   :  { %p819_p9 = pnand %p817_p8, %p814_p7 }
 0x187   :  { %822 = shalt.err (!%p819_p9)
}
 0x188   :  { %434 = dma.vmem_to_hbm [thread:$0]  %s429_s18, 512, %s957_s3, [#allocation4], %s830_s22, %s830_s22, %s831_s23  }
 0x189   :  { %827 = dma.done.wait [#allocation4], 512  }
 0x18a   :  { %828 = vsyncadd [#allocation4], 4294966784 }
 0x18b   :  { %438 = vsyncpa [#allocation3], 1 }
 0x18c   :  { %439 = vsyncpa [#allocation6], 1 }
 0x18d   :  { %440 = vsyncpa [#allocation4], 1 }

</bundles_post_ra>
